<compile_context>
chip_gen: v7x
topology: tpu7x:2x2x1
jax: 0.10.0
libtpu: 0.0.40
codegen_flags: <defaults>
</compile_context>

<pallas_src>
import jax
import jax.numpy as jnp
from jax.experimental import pallas as pl
from jax.experimental.pallas import tpu as pltpu

KS = 5            # kernel_size of the Cot module
PAD = KS // 2     # padding=2 in the PyTorch module


def _round_up(n, m):
    return ((n + m - 1) // m) * m


def cot_kernel(slab_ref, wbig_ref, wa1k_ref, wa2_ref, bias_ref, out_ref):
    # slab_ref : (1, 25*C, HW) bf16  im2col of the padded input, rows t*C + i
    # wbig_ref : (R, 25*C)    bf16  fused LHS (BN scales folded in):
    #                               rows [0:C)       -> 5x5 key conv
    #                               rows [Cp:Cp+C)   -> value 1x1 conv (center tap cols)
    #                               rows [2Cp:2Cp+M) -> attn conv #1, x-half (center tap)
    # wa1k_ref : (M, C)       bf16  attn conv #1, k1-half (BN3 scale folded in)
    # wa2_ref  : (C, M)       bf16  attn conv #2 with the mean-over-25-taps folded in
    # bias_ref : (R, 2)       f32   col 0 = BN shifts (same row layout as wbig),
    #                               col 1 rows [0:C) = folded attention bias
    # out_ref  : (1, C, HW)   f32
    C = out_ref.shape[1]
    M = wa1k_ref.shape[0]
    Cp = _round_up(C, 8)          # 8-aligned section stride -> cheap row slices

    # --- ONE MXU pass produces k1_pre / v / a1_x; BN shifts via one broadcast add ---
    big = (jnp.dot(wbig_ref[...], slab_ref[0],
                   preferred_element_type=jnp.float32)
           + bias_ref[:, 0:1])                                    # (R, HW) f32

    k1 = jnp.maximum(big[0:C, :], 0.0)                            # key_embed  (C, HW)
    v = big[Cp:Cp + C, :]                                         # value_embed (C, HW)

    # --- attention conv #1 on cat([k1, x]) without materializing the concat ---
    a1 = (jnp.dot(wa1k_ref[...], k1.astype(wa1k_ref.dtype),
                  preferred_element_type=jnp.float32)
          + big[2 * Cp:2 * Cp + M, :])                            # x-half + BN3 shift
    a1 = jnp.maximum(a1, 0.0)                                     # (M, HW)

    # --- attention conv #2 with the mean over the 25 taps folded in (exact) ---
    att = (jnp.dot(wa2_ref[...], a1.astype(wa2_ref.dtype),
                   preferred_element_type=jnp.float32)
           + bias_ref[0:C, 1:2])                                  # (C, HW)

    # --- softmax over the spatial axis (lanes), then weight v ---
    m = jnp.max(att, axis=1, keepdims=True)
    e = jnp.exp(att - m)
    inv = pl.reciprocal(jnp.sum(e, axis=1, keepdims=True), approx=True)
    out_ref[0] = k1 + (e * inv) * v


def cot_forward_pallas(x_nchw, p):
    B, C, H, W = x_nchw.shape
    HW = H * W
    KK = KS * KS
    M = p['w_a1'].shape[0]
    Cp = _round_up(C, 8)
    R = 2 * Cp + M
    center = KK // 2
    f32, bf16 = jnp.float32, jnp.bfloat16

    # ---- fold inference-BN scales into the conv weights (exact) ----
    wk = jnp.transpose(p['w_key'], (0, 2, 3, 1)).reshape(C, KK * C)      # (C, 25C)
    wk_eff = p['bn1_scale'][:, None] * wk
    wv_eff = p['bn2_scale'][:, None] * p['w_val'][:, :, 0, 0]            # (C, C)
    wa1 = p['w_a1'][:, :, 0, 0]                                          # (M, 2C)
    wa1k_eff = p['bn3_scale'][:, None] * wa1[:, :C]                      # (M, C)
    wa1x_eff = p['bn3_scale'][:, None] * wa1[:, C:]                      # (M, C)
    # fold the mean over the 25 taps into the second attention conv (exact;
    # assumes w_a2 output channels are ordered c*KK + t, as in the reference)
    wa2_eff = p['w_a2'][:, :, 0, 0].reshape(C, KK, M).mean(axis=1)       # (C, M)
    ba2_eff = p['b_a2'].reshape(C, KK).mean(axis=1)                      # (C,)

    # ---- single fused LHS: wv_eff / wa1x_eff ride along as extra rows placed
    #      at the center-tap columns (center tap of the slab == un-padded x) ----
    wbig = jnp.zeros((R, KK * C), f32)
    wbig = wbig.at[0:C, :].set(wk_eff)
    wbig = wbig.at[Cp:Cp + C, center * C:(center + 1) * C].set(wv_eff)
    wbig = wbig.at[2 * Cp:2 * Cp + M, center * C:(center + 1) * C].set(wa1x_eff)

    # ---- all per-channel shifts / biases packed into one (R, 2) stream ----
    bias = jnp.zeros((R, 2), f32)
    bias = bias.at[0:C, 0].set(p['bn1_shift'])
    bias = bias.at[Cp:Cp + C, 0].set(p['bn2_shift'])
    bias = bias.at[2 * Cp:2 * Cp + M, 0].set(p['bn3_shift'])
    bias = bias.at[0:C, 1].set(ba2_eff)

    # ---- im2col slab: (B, 25C, HW), rows t*C + i, channels on sublanes ----
    # TODO(synk): at production C/HW do the 5x5 conv in-kernel (shifted views)
    # instead of materializing the 25x slab in HBM.
    x = x_nchw.astype(f32)
    xpad = jnp.pad(x, ((0, 0), (0, 0), (PAD, PAD), (PAD, PAD)))
    taps = [xpad[:, :, dy:dy + H, dx:dx + W].reshape(B, C, HW)
            for dy in range(KS) for dx in range(KS)]
    slab = jnp.concatenate(taps, axis=1).astype(bf16)                    # (B, 25C, HW)

    grid_spec = pltpu.PrefetchScalarGridSpec(
        num_scalar_prefetch=0,
        grid=(B,),                          # B>=2 -> both v7x TensorCores busy
        in_specs=[
            pl.BlockSpec((1, KK * C, HW), lambda b: (b, 0, 0)),   # slab (per batch)
            pl.BlockSpec((R, KK * C), lambda b: (0, 0)),          # fused weights
            pl.BlockSpec((M, C), lambda b: (0, 0)),               # wa1 k1-half
            pl.BlockSpec((C, M), lambda b: (0, 0)),               # wa2 (mean folded)
            pl.BlockSpec((R, 2), lambda b: (0, 0)),               # packed biases
        ],
        out_specs=pl.BlockSpec((1, C, HW), lambda b: (b, 0, 0)),
    )

    out = pl.pallas_call(
        cot_kernel,
        out_shape=jax.ShapeDtypeStruct((B, C, HW), f32),
        grid_spec=grid_spec,
        compiler_params=pltpu.CompilerParams(
            dimension_semantics=("parallel",)),
    )(slab, wbig.astype(bf16), wa1k_eff.astype(bf16), wa2_eff.astype(bf16), bias)

    return out.reshape(B, C, H, W)          # already NCHW: no transposes needed


def init_params(key, C):
    """Deterministic synthetic parameters matching Cot(featureNum=C, kernel_size=5)."""
    M = 2 * C // 4
    ks = jax.random.split(key, 8)

    def conv_w(k, shape, scale=0.1):
        return scale * jax.random.normal(k, shape, jnp.float32)

    def bn(k, n):
        kg, kb, km, kv = jax.random.split(k, 4)
        gamma = 1.0 + 0.1 * jax.random.normal(kg, (n,), jnp.float32)
        beta = 0.1 * jax.random.normal(kb, (n,), jnp.float32)
        mean = 0.1 * jax.random.normal(km, (n,), jnp.float32)
        var = 1.0 + 0.1 * jnp.abs(jax.random.normal(kv, (n,), jnp.float32))
        scale = gamma / jnp.sqrt(var + 1e-5)
        shift = beta - mean * scale
        return scale, shift

    bn1s, bn1b = bn(ks[5], C)
    bn2s, bn2b = bn(ks[6], C)
    bn3s, bn3b = bn(ks[7], M)
    return dict(
        w_key=conv_w(ks[0], (C, C, KS, KS)),            # OIHW, 5x5, no bias
        w_val=conv_w(ks[1], (C, C, 1, 1)),              # OIHW, 1x1, no bias
        w_a1=conv_w(ks[2], (M, 2 * C, 1, 1)),           # OIHW, 1x1, no bias
        w_a2=conv_w(ks[3], (KS * KS * C, M, 1, 1)),     # OIHW, 1x1, with bias
        b_a2=0.1 * jax.random.normal(ks[4], (KS * KS * C,), jnp.float32),
        bn1_scale=bn1s, bn1_shift=bn1b,
        bn2_scale=bn2s, bn2_shift=bn2b,
        bn3_scale=bn3s, bn3_shift=bn3b,
    )


def cot_ref(x, p):
    """Pure-JAX f32 (NCHW) reference mirroring the PyTorch forward pass."""
    B, C, H, W = x.shape
    HP = jax.lax.Precision.HIGHEST
    k1 = jax.lax.conv_general_dilated(
        x, p['w_key'], (1, 1), ((PAD, PAD), (PAD, PAD)),
        dimension_numbers=('NCHW', 'OIHW', 'NCHW'), precision=HP)
    k1 = jnp.maximum(k1 * p['bn1_scale'][None, :, None, None]
                     + p['bn1_shift'][None, :, None, None], 0.0)

    v = jnp.einsum('bihw,oi->bohw', x, p['w_val'][:, :, 0, 0], precision=HP)
    v = v * p['bn2_scale'][None, :, None, None] + p['bn2_shift'][None, :, None, None]
    v = v.reshape(B, C, H * W)

    y = jnp.concatenate([k1, x], axis=1)
    a1 = jnp.einsum('bihw,oi->bohw', y, p['w_a1'][:, :, 0, 0], precision=HP)
    a1 = jnp.maximum(a1 * p['bn3_scale'][None, :, None, None]
                     + p['bn3_shift'][None, :, None, None], 0.0)
    att = jnp.einsum('bihw,oi->bohw', a1, p['w_a2'][:, :, 0, 0], precision=HP)
    att = att + p['b_a2'][None, :, None, None]
    att = att.reshape(B, C, KS * KS, H, W).mean(axis=2).reshape(B, C, H * W)
    k2 = (jax.nn.softmax(att, axis=-1) * v).reshape(B, C, H, W)
    return k1 + k2


if __name__ == "__main__":
    key = jax.random.PRNGKey(0)
    kx, kp = jax.random.split(key)
    B, C, H, W = 2, 8, 16, 16
    x = jax.random.normal(kx, (B, C, H, W), jnp.float32)
    params = init_params(kp, C)

    out = jax.block_until_ready(cot_forward_pallas(x, params))
    ref = jax.block_until_ready(cot_ref(x, params))

    assert out.shape == (B, C, H, W)
    # tolerance covers bf16 matmul inputs (f32 accumulation) + approx reciprocal
    max_err = float(jnp.max(jnp.abs(out - ref)))
    assert max_err < 5e-2, f"max abs err {max_err}"
    print("KERNEL_OK")
</pallas_src>

<mosaic_0001>
module attributes {stable_mosaic.version = 11 : i64} {
  func.func @cot_kernel(%arg0: i32, %arg1: memref<1x200x256xbf16, #tpu.memory_space<vmem>>, %arg2: memref<20x200xbf16, #tpu.memory_space<vmem>>, %arg3: memref<4x8xbf16, #tpu.memory_space<vmem>>, %arg4: memref<8x4xbf16, #tpu.memory_space<vmem>>, %arg5: memref<20x2xf32, #tpu.memory_space<vmem>>, %arg6: memref<1x8x256xf32, #tpu.memory_space<vmem>>) attributes {dimension_semantics = [#tpu.dimension_semantics<parallel>], iteration_bounds = array<i64: 2>, scalar_prefetch = 0 : i64, scratch_operands = 0 : i64, tpu.core_type = #tpu.core_type<tc>, window_params = [{transform_indices = @transform_0, window_bounds = array<i64: 1, 200, 256>}, {pipeline_mode = #tpu.pipeline_mode<synchronous>, transform_indices = @transform_1, window_bounds = array<i64: 20, 200>}, {pipeline_mode = #tpu.pipeline_mode<synchronous>, transform_indices = @transform_2, window_bounds = array<i64: 4, 8>}, {pipeline_mode = #tpu.pipeline_mode<synchronous>, transform_indices = @transform_3, window_bounds = array<i64: 8, 4>}, {pipeline_mode = #tpu.pipeline_mode<synchronous>, transform_indices = @transform_4, window_bounds = array<i64: 20, 2>}, {transform_indices = @transform_5, window_bounds = array<i64: 1, 8, 256>}]} {
    %c0 = arith.constant 0 : index
    %c0_0 = arith.constant 0 : index
    %0 = vector.load %arg2[%c0, %c0_0] : memref<20x200xbf16, #tpu.memory_space<vmem>>, vector<20x200xbf16>
    %c0_1 = arith.constant 0 : index
    %c0_2 = arith.constant 0 : index
    %c0_3 = arith.constant 0 : index
    %1 = vector.load %arg1[%c0_1, %c0_2, %c0_3] : memref<1x200x256xbf16, #tpu.memory_space<vmem>>, vector<1x200x256xbf16>
    %2 = vector.shape_cast %1 : vector<1x200x256xbf16> to vector<200x256xbf16>
    %cst = arith.constant dense<0.000000e+00> : vector<20x256xf32>
    %3 = tpu.matmul %0, %2, %cst {dimension_numbers = #tpu.dot_dimension_numbers<[1], [0], [0], [1], [0, 0, 1, 1], [], []>} : vector<20x200xbf16>, vector<200x256xbf16>, vector<20x256xf32> -> vector<20x256xf32>
    %c0_4 = arith.constant 0 : index
    %c0_5 = arith.constant 0 : index
    %4 = vector.load %arg5[%c0_4, %c0_5] : memref<20x2xf32, #tpu.memory_space<vmem>>, vector<20x1xf32>
    %5 = vector.broadcast %4 : vector<20x1xf32> to vector<20x256xf32>
    %6 = arith.addf %3, %5 : vector<20x256xf32>
    %7 = vector.extract_strided_slice %6 {offsets = [0, 0], sizes = [8, 256], strides = [1, 1]} : vector<20x256xf32> to vector<8x256xf32>
    %cst_6 = arith.constant 0.000000e+00 : f32
    %8 = vector.broadcast %cst_6 : f32 to vector<8x256xf32>
    %9 = arith.maximumf %7, %8 : vector<8x256xf32>
    %10 = vector.extract_strided_slice %6 {offsets = [8, 0], sizes = [8, 256], strides = [1, 1]} : vector<20x256xf32> to vector<8x256xf32>
    %c0_7 = arith.constant 0 : index
    %c0_8 = arith.constant 0 : index
    %11 = vector.load %arg3[%c0_7, %c0_8] : memref<4x8xbf16, #tpu.memory_space<vmem>>, vector<4x8xbf16>
    %12 = arith.truncf %9 : vector<8x256xf32> to vector<8x256xbf16>
    %cst_9 = arith.constant dense<0.000000e+00> : vector<4x256xf32>
    %13 = tpu.matmul %11, %12, %cst_9 {dimension_numbers = #tpu.dot_dimension_numbers<[1], [0], [0], [1], [0, 0, 1, 1], [], []>} : vector<4x8xbf16>, vector<8x256xbf16>, vector<4x256xf32> -> vector<4x256xf32>
    %14 = vector.extract_strided_slice %6 {offsets = [16, 0], sizes = [4, 256], strides = [1, 1]} : vector<20x256xf32> to vector<4x256xf32>
    %15 = arith.addf %13, %14 : vector<4x256xf32>
    %cst_10 = arith.constant 0.000000e+00 : f32
    %16 = vector.broadcast %cst_10 : f32 to vector<4x256xf32>
    %17 = arith.maximumf %15, %16 : vector<4x256xf32>
    %c0_11 = arith.constant 0 : index
    %c0_12 = arith.constant 0 : index
    %18 = vector.load %arg4[%c0_11, %c0_12] : memref<8x4xbf16, #tpu.memory_space<vmem>>, vector<8x4xbf16>
    %19 = arith.truncf %17 : vector<4x256xf32> to vector<4x256xbf16>
    %cst_13 = arith.constant dense<0.000000e+00> : vector<8x256xf32>
    %20 = tpu.matmul %18, %19, %cst_13 {dimension_numbers = #tpu.dot_dimension_numbers<[1], [0], [0], [1], [0, 0, 1, 1], [], []>} : vector<8x4xbf16>, vector<4x256xbf16>, vector<8x256xf32> -> vector<8x256xf32>
    %c0_14 = arith.constant 0 : index
    %c1 = arith.constant 1 : index
    %21 = vector.load %arg5[%c0_14, %c1] : memref<20x2xf32, #tpu.memory_space<vmem>>, vector<8x1xf32>
    %22 = vector.broadcast %21 : vector<8x1xf32> to vector<8x256xf32>
    %23 = arith.addf %20, %22 : vector<8x256xf32>
    %cst_15 = arith.constant dense<0xFF800000> : vector<8xf32>
    %24 = vector.multi_reduction <maximumf>, %23, %cst_15 [1] : vector<8x256xf32> to vector<8xf32>
    %25 = vector.shape_cast %24 : vector<8xf32> to vector<8x1xf32>
    %26 = vector.broadcast %25 : vector<8x1xf32> to vector<8x256xf32>
    %27 = arith.subf %23, %26 : vector<8x256xf32>
    %28 = math.exp %27 : vector<8x256xf32>
    %cst_16 = arith.constant dense<0.000000e+00> : vector<8xf32>
    %29 = vector.multi_reduction <add>, %28, %cst_16 [1] : vector<8x256xf32> to vector<8xf32>
    %30 = vector.shape_cast %29 : vector<8xf32> to vector<8x1xf32>
    %31 = tpu.reciprocal %30 {approx = true} : vector<8x1xf32> -> vector<8x1xf32>
    %32 = vector.broadcast %31 : vector<8x1xf32> to vector<8x256xf32>
    %33 = arith.mulf %28, %32 : vector<8x256xf32>
    %34 = arith.mulf %33, %10 : vector<8x256xf32>
    %35 = arith.addf %9, %34 : vector<8x256xf32>
    %c0_17 = arith.constant 0 : index
    %c0_18 = arith.constant 0 : index
    %c0_19 = arith.constant 0 : index
    %36 = vector.load %arg6[%c0_17, %c0_18, %c0_19] : memref<1x8x256xf32, #tpu.memory_space<vmem>>, vector<1x8x256xf32>
    %37 = vector.shape_cast %36 : vector<1x8x256xf32> to vector<8x256xf32>
    %38 = vector.shape_cast %35 : vector<8x256xf32> to vector<1x8x256xf32>
    tpu.vector_store %arg6[%c0_17, %c0_18, %c0_19], %38 {strides = array<i32>} : memref<1x8x256xf32, #tpu.memory_space<vmem>>, vector<1x8x256xf32>,
    return
  }
  func.func @transform_0(%arg0: i32) -> (i32, i32, i32) {
    %c0_i32 = arith.constant 0 : i32
    %c0_i32_0 = arith.constant 0 : i32
    %c0_i32_1 = arith.constant 0 : i32
    return %arg0, %c0_i32, %c0_i32_0 : i32, i32, i32
  }
  func.func @transform_1(%arg0: i32) -> (i32, i32) {
    %c0_i32 = arith.constant 0 : i32
    %c0_i32_0 = arith.constant 0 : i32
    %c0_i32_1 = arith.constant 0 : i32
    return %c0_i32, %c0_i32_0 : i32, i32
  }
  func.func @transform_2(%arg0: i32) -> (i32, i32) {
    %c0_i32 = arith.constant 0 : i32
    %c0_i32_0 = arith.constant 0 : i32
    %c0_i32_1 = arith.constant 0 : i32
    return %c0_i32, %c0_i32_0 : i32, i32
  }
  func.func @transform_3(%arg0: i32) -> (i32, i32) {
    %c0_i32 = arith.constant 0 : i32
    %c0_i32_0 = arith.constant 0 : i32
    %c0_i32_1 = arith.constant 0 : i32
    return %c0_i32, %c0_i32_0 : i32, i32
  }
  func.func @transform_4(%arg0: i32) -> (i32, i32) {
    %c0_i32 = arith.constant 0 : i32
    %c0_i32_0 = arith.constant 0 : i32
    %c0_i32_1 = arith.constant 0 : i32
    return %c0_i32, %c0_i32_0 : i32, i32
  }
  func.func @transform_5(%arg0: i32) -> (i32, i32, i32) {
    %c0_i32 = arith.constant 0 : i32
    %c0_i32_0 = arith.constant 0 : i32
    %c0_i32_1 = arith.constant 0 : i32
    return %arg0, %c0_i32, %c0_i32_0 : i32, i32, i32
  }
}

</mosaic_0001>

<bundles_post_ra>
// kernel: tpu_custom_call.1
= control target key start
LH: loop header
LB: loop body
LE: loop exit
PB: predicated region body
PF: predicated region fallthrough
CT: control target
= control target key end

     0   :  { %10 = vsyncpa [#allocation3], 0  ;;  %s1278_s0 = inlined_call_operand.hbm [shape: bf16[2,200,256], index: 0, kind: input, shape index: {}]   ;;  %s1279_s1 = inlined_call_operand.vmem [shape: bf16[20,200], index: 1, kind: input, shape index: {}]   ;;  %s1280_s2 = inlined_call_operand.vmem [shape: bf16[4,8], index: 2, kind: input, shape index: {}]   ;;  %s1281_s3 = inlined_call_operand.vmem [shape: bf16[8,4], index: 3, kind: input, shape index: {}]   ;;  %s1282_s4 = inlined_call_operand.vmem [shape: f32[20,2], index: 4, kind: input, shape index: {}]   ;;  %s1283_s5 = inlined_call_operand.hbm [shape: f32[2,8,256], index: 5, kind: output, shape index: {}]  }
   0x1   :  { %12 = vsyncpa [#allocation3 + $0x1], 0 }
   0x2   :  { %13 = vsyncpa [#allocation4], 0 }
   0x3   :  { %15 = vsyncpa [#allocation4 + $0x1], 0  ;;  %s1038_s18 = smov 0   ;;  %s1040_s19 = smov 0  }
   0x4   :  { %s1042_s20 = smov 0   ;;  %s1044_s21 = smov 0  }
   0x5 LB: > { %s1059_s22 = sadd.s32 4294967295, %s1000_s21   ;;  %s720_s23 = sadd.s32 4294967294, %s1000_s21   ;;  %s1000_s21 = sphi %s1044_s21, %s1295_s21   ;;  %s996_s20 = sphi %s1042_s20, %s1294_s20   ;;  %s992_s19 = sphi %s1040_s19, %s1293_s19   ;;  %s988_s18 = sphi %s1038_s18, %s1292_s18  }
   0x6   : > { %s1063_s24 = sadd.s32 1, %s1000_s21   ;;  %s28_s25 = sadd.s32 1, %s996_s20 }
   0x7   : > { %s25_s26 = ssub.s32 %s1000_s21, %s1063_s24  ;;  %p35_p0 = scmp.ne.s32.totalorder %s996_s20, %s992_s19 }
   0x8   : > { %p26_p1 = scmp.eq.s32.totalorder %s25_s26, 0  ;;  %p36_p2 = scmp.eq.s32.totalorder %s1000_s21, 0 }
   0x9   : > { %p41_p3 = scmp.ne.s32.totalorder %s992_s19, %s988_s18  ;;  %p42_p4 = scmp.eq.s32.totalorder %s1059_s22, 0 }
   0xa   : > { %s1075_s27 = scalar_select %p26_p1, %s996_s20, %s28_s25  }
   0xb   : > { %p37_p5 = por %p36_p2, %p35_p0  ;;  %p1077_p6 = por %p42_p4, %p41_p3 }
   0xc   : > { %p149_p7 = scmp.eq.s32.totalorder %s1059_s22, 1  ;;  %p155_p8 = scmp.eq.s32.totalorder %s720_s23, 1 }
   0xd   : > { %p814_p10 = scmp.lt.s32.totalorder %s1000_s21, 2  ;;  %s187_s6 = sand.u32 1, %s996_s20  }
   0xe   : > { %p1084_p11 = por %p149_p7, %p35_p0  ;;  %p1088_p12 = por %p155_p8, %p41_p3 }
   0xf   : > { %s800_s7 = smul.u32 3200, %s1000_s21  ;;  %p1099_p13 = pnand %p814_p10, %p37_p5 }
  0x10   : > { %s1286_s29 = scalar_select %p1084_p11, 1, 0 }
  0x11   : > { %s1287_s30 = scalar_select %p1088_p12, 1, 0 }
  0x12   : > { %s799_s8 = smul.u32 200, %s187_s6  ;;  %s1097_s11 = scalar_lea.hbm %s1278_s0, %s800_s7 }
  0x13   : > { %s1105_s15 = scalar_lea.sflag [#allocation3], %s187_s6  ;;  %s904_s16 = scalar_lea.hbm %s1097_s11, 3200 }
  0x14   : > { %s191_s13 = scalar_lea.vmem [#allocation2], %s799_s8  ;;  %p905_p0 = scmp.ne.s32.totalorder %s1097_s11, %s904_s16 }
  0x15   : > { %s198_s14 = sshll.u32 %s191_s13, 4  ;;  %p906_p1 = pneg %p1099_p13  ;;  %s1103_s14 = int_to_ptr.vmem [resolvable:$true] %s198_s14 }
  0x16   : > { %s909_s25 = scalar_lea.hbm %s1278_s0, 6400  ;;  %p910_p4 = scmp.lt.u32.totalorder %s1097_s11, %s1278_s0 }
  0x17   : > { %p907_p2 = pnand %p906_p1, %p905_p0  ;;  %p911_p5 = scmp.lt.u32.totalorder %s909_s25, %s904_s16 }
  0x18   : > { %p913_p8 = scmp.lt.u32.totalorder %s904_s16, %s1097_s11 }
  0x19   : > { %p908_p3 = pneg %p907_p2  ;;  %p912_p7 = por %p911_p5, %p910_p4 }
  0x1b   : > { %p914_p10 = por %p913_p8, %p912_p7 }
  0x1d   : > { %p915_p9 = pnand %p914_p10, %p908_p3 }
  0x1f   : > { %918 = shalt.err (!%p915_p9)
}
  0x20   : > { %s919_s6 = scalar_lea.vmem %s1103_s14, 3200  ;;  %s1002_s8 = smov [#allocation2]  }
  0x21   : > { %p920_p0 = scmp.ne.s32.totalorder %s1103_s14, %s919_s6  ;;  %s924_s9 = sshll.u32 %s1002_s8, 4  ;;  %s925_s9 = int_to_ptr.vmem [resolvable:$false] %s924_s9 }
  0x22   : > { %s926_s10 = scalar_lea.vmem %s925_s9, 6400  ;;  %p927_p11 = scmp.lt.s32.totalorder %s1103_s14, %s925_s9 }
  0x23   : > { %p922_p2 = pnand %p920_p0, %p906_p1  ;;  %p928_p4 = scmp.lt.s32.totalorder %s926_s10, %s919_s6 }
  0x25   : > { %p923_p12 = pneg %p922_p2  ;;  %p929_p5 = por %p928_p4, %p927_p11 }
  0x27   : > { %p930_p7 = pnand %p929_p5, %p923_p12 }
  0x29   : > { %933 = shalt.err (!%p930_p7)
}
  0x2a   : > { %s1003_s13 = smov 128   ;;  %s1004_s16 = smov 8  }
  0x2b   : > { %809 = dma.hbm_to_vmem [thread:$0]  (!%p1099_p13), %s1097_s11, 3200, %s1103_s14, %s1105_s15, %s1003_s13, %s1003_s13, %s1004_s16  }
  0x2c   : > { %p724_p9 = scmp.ge.s32.totalorder %s1000_s21, 1  ;;  %p206_p1 = scmp.lt.s32.totalorder %s1000_s21, 3 }
  0x2e   : > { %p207_p3 = pnand %p724_p9, %p206_p1 }
  0x2f   : > { %s1136_s17 = sand.u32 (!%p207_p3), 1, %s992_s19  }
  0x30   : > { %210 = sbr.rel (%p207_p3) target bundleno = 1105 (0x451), region = 40  ;;  %s213_s25 = scalar_lea.sflag (!%p207_p3), [#allocation3], %s1136_s17 }
  0x31   : > { %s801_s23 = smul.u32 (!%p207_p3), 200, %s1136_s17 }
  0x33   : > { %s1140_s26 = scalar_lea.vmem (!%p207_p3), [#allocation2], %s801_s23 }
  0x37   : > { %979 = dma.done.wait (%p1077_p6), %s213_s25, 3200  }
  0x38   : > { %981 = vsyncadd (%p1077_p6), %s213_s25, 4294964096  ;;  %v1005_v0 = vmov 0   ;;  %v855_v1 = vld [vmem:[%s1140_s26 + $0x4] ss:$8 sps:$4 sm:$0xff]   ;;  %v857_v2 = vld [vmem:[%s1140_s26] ss:$8 sps:$4 sm:$0xff]  }
  0x39   : > { %852 = vset.pattern.permute.xlu0 %v1005_v0  ;;  %444 = vmatprep.subr.bf16.mxu0 %v855_v1  ;;  %v858_v3 = vld [vmem:[%s1140_s26 + $0x14] ss:$8 sps:$4 sm:$0xff]   ;;  %v860_v4 = vld [vmem:[%s1140_s26 + $0x10] ss:$8 sps:$4 sm:$0xff]   ;;  %v861_v5 = vld [vmem:[%s1140_s26 + $0x24] ss:$8 sps:$4 sm:$0xff]  }
  0x3a   : > { %769 = vmatprep.subr.bf16.mxu1 %v855_v1  ;;  %445 = vmatpush1.bf16.msra.mxu0 %v857_v2  ;;  %v863_v6 = vld [vmem:[%s1140_s26 + $0x20] ss:$8 sps:$4 sm:$0xff]   ;;  %v864_v7 = vld [vmem:[%s1140_s26 + $0x34] ss:$8 sps:$4 sm:$0xff]   ;;  %v866_v8 = vld [vmem:[%s1140_s26 + $0x30] ss:$8 sps:$4 sm:$0xff]  }
  0x3b   : > { %782 = vmatpush1.bf16.msra.mxu1 %v857_v2  ;;  %446 = vmatprep.subr.bf16.mxu0 %v858_v3  ;;  %v867_v9 = vld [vmem:[%s1140_s26 + $0x44] ss:$8 sps:$4 sm:$0xff]   ;;  %v869_v10 = vld [vmem:[%s1140_s26 + $0x40] ss:$8 sps:$4 sm:$0xff]   ;;  %v870_v11 = vld [vmem:[%s1140_s26 + $0x54] ss:$8 sps:$4 sm:$0xff]  }
  0x3c   : > { %770 = vmatprep.subr.bf16.mxu1 %v858_v3  ;;  %v895_v12 = vld [vmem:[%s1279_s1 + $0x4] ss:$8 sps:$4 sm:$0xff]   ;;  %v1164_v13 = vld [vmem:[%s1279_s1 + $0x10] sm:$0x33]  ;;  %vm430_vm0 = vcmask 588800   ;;  %vm437_vm1 = vcmask 1043456  }
  0x3d   : > { %v729_v14 = vcombine.high %v1164_v13, %v1164_v13  ;;  %v872_v15 = vld [vmem:[%s1140_s26 + $0x50] ss:$8 sps:$4 sm:$0xff]   ;;  %v873_v17 = vld [vmem:[%s1140_s26 + $0x64] ss:$8 sps:$4 sm:$0xff]   ;;  %757 = vmatprep.mubr.msk.bf16.mxu0 %vm430_vm0, %v895_v12  ;;  %v875_v18 = vld [vmem:[%s1140_s26 + $0x60] ss:$8 sps:$4 sm:$0xff]   ;;  %v728_v35 = vcombine.low %v1164_v13, %v1164_v13 }
  0x3e   : > { %447 = vmatpush1.bf16.msra.mxu0 %v860_v4  ;;  %v1172_v16 = vld [vmem:[%s1282_s4] sm:$0xff]  ;;  %v274_v19 = vld [vmem:[%s1282_s4 + $0x10] sm:$0xf]  ;;  %vm500_vm2 = vcmask 64512   ;;  %v1006_v53 = vmov 1   ;;  %vm566_vm3 = vcmask 1041408  }
  0x3f   : > { %783 = vmatpush1.bf16.msra.mxu1 %v860_v4  ;;  %448 = vmatprep.subr.bf16.mxu0 %v861_v5  ;;  %v876_v20 = vld [vmem:[%s1140_s26 + $0x74] ss:$8 sps:$4 sm:$0xff]   ;;  %v878_v21 = vld [vmem:[%s1140_s26 + $0x70] ss:$8 sps:$4 sm:$0xff]   ;;  %v879_v22 = vld [vmem:[%s1140_s26 + $0x84] ss:$8 sps:$4 sm:$0xff]  }
  0x40   : > { %771 = vmatprep.subr.bf16.mxu1 %v861_v5  ;;  %758 = vmatprep.mubr.msk.bf16.mxu1 %vm430_vm0, %v729_v14  ;;  %v881_v23 = vld [vmem:[%s1140_s26 + $0x80] ss:$8 sps:$4 sm:$0xff]   ;;  %v882_v24 = vld [vmem:[%s1140_s26 + $0x94] ss:$8 sps:$4 sm:$0xff]   ;;  %v884_v25 = vld [vmem:[%s1140_s26 + $0x90] ss:$8 sps:$4 sm:$0xff]  }
  0x41   : > { %277 = vperm.xlu0 %852, %v1172_v16   ;;  %v885_v26 = vld [vmem:[%s1140_s26 + $0xa4] ss:$8 sps:$4 sm:$0xff]   ;;  %v887_v27 = vld [vmem:[%s1140_s26 + $0xa0] ss:$8 sps:$4 sm:$0xff]   ;;  %v888_v28 = vld [vmem:[%s1140_s26 + $0xb4] ss:$8 sps:$4 sm:$0xff]   ;;  %853 = vset.pattern.permute.xlu1 %v1006_v53 }
  0x42   : > { %449 = vmatpush1.bf16.msra.mxu0 %v863_v6  ;;  %v271_v29 = vld [vmem:[%s1140_s26 + $0xc0] sm:$0xff]  ;;  %v890_v30 = vld [vmem:[%s1140_s26 + $0xb0] ss:$8 sps:$4 sm:$0xff]   ;;  %559 = vperm.xlu1 %853, %v1172_v16   ;;  %vm562_vm4 = vcmask 31744   ;;  %s725_s11 = sshll.u32 %s1136_s17, 4  ;;  %s768_s12 = sshll.u32 %s1059_s22, 8 }
  0x43   : > { %784 = vmatpush1.bf16.msra.mxu1 %v863_v6  ;;  %450 = vmatprep.subr.bf16.mxu0 %v864_v7  ;;  %v755_v31 = vcombine.high %v271_v29, %v271_v29  ;;  %v754_v32 = vcombine.low %v271_v29, %v271_v29  ;;  %v893_v34 = vld [vmem:[%s1279_s1] ss:$8 sps:$4 sm:$0xff]   ;;  %s242_s14 = scalar_lea.vmem [#allocation5], %s725_s11  ;;  %s1234_s8 = scalar_lea.hbm %s1283_s5, %s768_s12 }
  0x44   : > { %772 = vmatprep.subr.bf16.mxu1 %v864_v7  ;;  %v497_v52 = vld [vmem:[%s1280_s2] sm:$0x3]  ;;  %s650_s15 = sshll.u32 %s242_s14, 4  ;;  %s636_s22 = scalar_lea.sflag [#allocation4], %s1136_s17  ;;  %s1236_s15 = int_to_ptr.vmem [resolvable:$true] %s650_s15 }
  0x45   : > { %287 = vperm.xlu0 %852, %v274_v19   ;;  %v439_v33 = vsel %vm437_vm1, %v754_v32, 0  ;;  %v553_v4 = vld [vmem:[%s1281_s3] sm:$0xf]  ;;  %s934_s9 = scalar_lea.vmem %s1236_s15, 256  ;;  %p1289_p11 = scmp.ne.s32.totalorder %s1286_s29, 0 }
  0x46   : > { %451 = vmatpush1.bf16.msra.mxu0 %v866_v8  ;;  %p935_p6 = scmp.ne.s32.totalorder %s1236_s15, %s934_s9  ;;  %s1007_s10 = smov [#allocation5]  }
  0x47   : > { %785 = vmatpush1.bf16.msra.mxu1 %v866_v8  ;;  %452 = vmatprep.subr.bf16.mxu0 %v867_v9  ;;  %s938_s13 = sshll.u32 %s1007_s10, 4  ;;  %s939_s13 = int_to_ptr.vmem [resolvable:$false] %s938_s13 }
  0x48   : > { %773 = vmatprep.subr.bf16.mxu1 %v867_v9  ;;  %p936_p12 = pnand %p935_p6, %p1289_p11  ;;  %s940_s16 = scalar_lea.vmem %s939_s13, 512 }
  0x49   : > { %p941_p8 = scmp.lt.s32.totalorder %s1236_s15, %s939_s13  ;;  %p942_p10 = scmp.lt.s32.totalorder %s940_s16, %s934_s9 }
  0x4a   : > { %453 = vmatpush1.bf16.msra.mxu0 %v869_v10  ;;  %p937_p13 = pneg %p936_p12 }
  0x4b   : > { %786 = vmatpush1.bf16.msra.mxu1 %v869_v10  ;;  %454 = vmatprep.subr.bf16.mxu0 %v870_v11  ;;  %p943_p0 = por %p942_p10, %p941_p8 }
  0x4c   : > { %774 = vmatprep.subr.bf16.mxu1 %v870_v11 }
  0x4d   : > { %p944_p2 = pnand %p943_p0, %p937_p13 }
  0x4e   : > { %455 = vmatpush1.bf16.msra.mxu0 %v872_v15 }
  0x4f   : > { %787 = vmatpush1.bf16.msra.mxu1 %v872_v15  ;;  %456 = vmatprep.subr.bf16.mxu0 %v873_v17 }
  0x50   : > { %775 = vmatprep.subr.bf16.mxu1 %v873_v17 }
  0x52   : > { %457 = vmatpush1.bf16.msra.mxu0 %v875_v18 }
  0x53   : > { %788 = vmatpush1.bf16.msra.mxu1 %v875_v18  ;;  %458 = vmatprep.subr.bf16.mxu0 %v876_v20 }
  0x54   : > { %776 = vmatprep.subr.bf16.mxu1 %v876_v20 }
  0x56   : > { %459 = vmatpush1.bf16.msra.mxu0 %v878_v21 }
  0x57   : > { %789 = vmatpush1.bf16.msra.mxu1 %v878_v21  ;;  %460 = vmatprep.subr.bf16.mxu0 %v879_v22  ;;  %v273_v21 = vld [vmem:[%s1282_s4 + $0x8] sm:$0xff] }
  0x58   : > { %777 = vmatprep.subr.bf16.mxu1 %v879_v22 }
  0x5a   : > { %461 = vmatpush1.bf16.msra.mxu0 %v881_v23 }
  0x5b   : > { %790 = vmatpush1.bf16.msra.mxu1 %v881_v23  ;;  %462 = vmatprep.subr.bf16.mxu0 %v882_v24 }
  0x5c   : > { %778 = vmatprep.subr.bf16.mxu1 %v882_v24 }
  0x5e   : > { %463 = vmatpush1.bf16.msra.mxu0 %v884_v25 }
  0x5f   : > { %791 = vmatpush1.bf16.msra.mxu1 %v884_v25  ;;  %464 = vmatprep.subr.bf16.mxu0 %v885_v26 }
  0x60   : > { %779 = vmatprep.subr.bf16.mxu1 %v885_v26 }
  0x62   : > { %465 = vmatpush1.bf16.msra.mxu0 %v887_v27 }
  0x63   : > { %792 = vmatpush1.bf16.msra.mxu1 %v887_v27  ;;  %466 = vmatprep.subr.bf16.mxu0 %v888_v28 }
  0x64   : > { %780 = vmatprep.subr.bf16.mxu1 %v888_v28 }
  0x66   : > { %467 = vmatpush1.bf16.msra.mxu0 %v890_v30 }
  0x67   : > { %793 = vmatpush1.bf16.msra.mxu1 %v890_v30  ;;  %756 = vmatprep.subr.msk.bf16.mxu0 %vm437_vm1, %v755_v31 }
  0x68   : > { %781 = vmatprep.subr.msk.bf16.mxu1 %vm437_vm1, %v755_v31 }
  0x6a   : > { %469 = vmatpush1.bf16.msra.mxu0 %v439_v33 }
  0x6b   : > { %794 = vmatpush1.bf16.msra.mxu1 %v439_v33 }
  0x6d   : > { %477 = vmatmul.mubr.bf16.vlgmr.msra.gmra.mrb[0].mxu0 %v893_v34 }
  0x6e   : > { %487 = vmatmul.mubr.bf16.vlgmr.msra.gmra.mrb[0].mxu1 %v728_v35  ;;  %542 = vmatprep.mubr.bf16.mxu0 %v1005_v0 }
  0x6f   : > { %605 = vmatprep.mubr.bf16.mxu1 %v1005_v0 }
  0xc0   : > { %v278_v36 = vpop.permute.xlu0 %277 }
  0xc1   : > { %v560_v5 = vpop.permute.xlu1 %559 }
  0xc4   : > { %v288_v54 = vpop.permute.xlu0 %287 }
 0x140   : > { %v478_v37 = vpop.f32.mrb[0].mxu0 }
 0x141   : > { %v488_v38 = vpop.f32.mrb[0].mxu1  ;;  %v479_v39 = vadd.f32 %v478_v37, %v278_v36  ;;  %v480_v40 = vpop.f32.mrb[1].mxu0 }
 0x142   : > { %v490_v41 = vpop.f32.mrb[1].mxu1  ;;  %v481_v42 = vadd.f32 %v480_v40, %v278_v36  ;;  %v1201_v43 = vpop.f32.mrb[2].mxu0  ;;  %v489_v55 = vadd.f32 %v488_v38, %v288_v54 }
 0x143   : > { %v492_v44 = vpop.f32.mrb[2].mxu1  ;;  %v1203_v45 = vmax.f32 %v479_v39, 0.0  ;;  %v1205_v46 = vpop.f32.mrb[3].mxu0  ;;  %v491_v56 = vadd.f32 %v490_v41, %v288_v54 }
 0x144   : > { %v493_v47 = vpop.f32.mrb[3].mxu1  ;;  %v1207_v48 = vmax.f32 %v481_v42, 0.0 }
 0x145   : > { %v498_v49 = vpack.c.bf16 %v1203_v45, %v1203_v45 }
 0x146   : > { %v499_v50 = vpack.c.bf16 %v1207_v48, %v1207_v48 }
 0x147   : > { %v505_v51 = vsel %vm437_vm1, %v498_v49, 0 }
 0x148   : > { %759 = vmatprep.subr.msk.bf16.mxu0 %vm437_vm1, %v499_v50 }
 0x149   : > { %511 = vmatpush1.bf16.msra.mxu0 %v505_v51 }
 0x14c   : > { %760 = vmatmul.mubr.msk.bf16.vlgmr.msra.gmra.mrb[4].mxu0 %vm500_vm2, %v497_v52 }
 0x21f   : > { %v544_v57 = vpop.f32.mrb[4].mxu0 }
 0x220   : > { %v545_v58 = vadd.f32 %v544_v57, %v489_v55  ;;  %v546_v59 = vpop.f32.mrb[5].mxu0 }
 0x221   : > { %v547_v60 = vadd.f32 %v546_v59, %v491_v56  ;;  %v548_v61 = vpop.f32.mrb[6].mxu0 }
 0x222   : > { %v551_v62 = vmax.f32 %v545_v58, 0.0  ;;  %v549_v63 = vpop.f32.mrb[7].mxu0 }
 0x223   : > { %v552_v0 = vmax.f32 %v547_v60, 0.0 }
 0x224   : > { %v554_v1 = vpack.c.bf16 %v551_v62, %v551_v62 }
 0x225   : > { %v555_v2 = vpack.c.bf16 %v552_v0, %v552_v0 }
 0x226   : > { %v568_v3 = vsel %vm566_vm3, %v554_v1, 0 }
 0x227   : > { %761 = vmatprep.subr.msk.bf16.mxu1 %vm566_vm3, %v555_v2 }
 0x228   : > { %574 = vmatpush1.bf16.msra.mxu1 %v568_v3 }
 0x22b   : > { %762 = vmatmul.mubr.msk.bf16.vlgmr.msra.gmra.mrb[4].mxu1 %vm562_vm4, %v553_v4 }
 0x2fe   : > { %v607_v6 = vpop.f32.mrb[4].mxu1 }
 0x2ff   : > { %v608_v7 = vadd.f32 %v607_v6, %v560_v5  ;;  %v609_v8 = vpop.f32.mrb[5].mxu1 }
 0x300   : > { %v610_v9 = vadd.f32 %v609_v8, %v560_v5  ;;  %v611_v10 = vpop.f32.mrb[6].mxu1 }
 0x301   : > { %v612_v11 = vpop.f32.mrb[7].mxu1 }
 0x302   : > { %v614_v12 = vmax.f32 %v608_v7, %v610_v9 }
 0x304   : > { %615 = vmax.xlane.f32.xlu1 %v614_v12 }
 0x391   : > { %v616_v13 = vpop.xlane.xlu1 %615 }
 0x392   : > { %v617_v14 = vsub.f32 %v608_v7, %v616_v13  ;;  %v618_v15 = vsub.f32 %v610_v9, %v616_v13 }
 0x394   : > { %v619_v16 = vmul.f32 1.442695, %v617_v14  ;;  %v621_v17 = vmul.f32 1.442695, %v618_v15 }
 0x396   : > { %898 = vpow2.f32 %v619_v16 }
 0x397   : > { %900 = vpow2.f32 %v621_v17 }
 0x3a0   : > { %v899_v18 = vpop.eup %898 }
 0x3a1   : > { %v901_v19 = vpop.eup %900 }
 0x3a2   : > { %v623_v20 = vadd.f32 %v901_v19, %v899_v18 }
 0x3a4   : > { %624 = vadd.xlane.f32.xlu0 %v623_v20 }
 0x3ba   : > { %282 = vperm.xlu0 %852, %v273_v21  }
 0x3be   : > { %854 = vset.pattern.permute.xlu0 %v1006_v53 }
 0x431   : > { %v625_v22 = vpop.xlane.xlu0 %624 }
 0x432   : > { %902 = vrcp.f32 %v625_v22 }
 0x439   : > { %v283_v23 = vpop.permute.xlu0 %282 }
 0x43a   : > { %v483_v27 = vadd.f32 %v1201_v43, %v283_v23  ;;  %v485_v28 = vadd.f32 %v1205_v46, %v283_v23 }
 0x43c   : > { %v903_v24 = vpop.eup %902 }
 0x43d   : > { %v627_v25 = vmul.f32 %v903_v24, %v899_v18  ;;  %v628_v26 = vmul.f32 %v903_v24, %v901_v19 }
 0x43f   : > { %v629_v29 = vmul.f32 %v627_v25, %v483_v27  ;;  %v630_v30 = vmul.f32 %v628_v26, %v485_v28 }
 0x441   : > { %v631_v31 = vadd.f32 %v629_v29, %v1203_v45  ;;  %v632_v32 = vadd.f32 %v630_v30, %v1207_v48 }
 0x443   : > { %633 = vst [vmem:[%s242_s14] sm:$0xff] %v631_v31  ;;  %634 = vst [vmem:[%s242_s14 + $0x8] sm:$0xff] %v632_v32 }
 0x444   : > { %947 = shalt.err (!%p944_p2)
}
 0x445   : > { %s948_s17 = scalar_lea.hbm %s1234_s8, 256  ;;  %s952_s26 = scalar_lea.hbm %s1283_s5, 512 }
 0x446   : > { %p949_p4 = scmp.ne.s32.totalorder %s1234_s8, %s948_s17  ;;  %p953_p9 = scmp.lt.u32.totalorder %s1234_s8, %s1283_s5 }
 0x447   : > { %p954_p1 = scmp.lt.u32.totalorder %s952_s26, %s948_s17  ;;  %p956_p6 = scmp.lt.u32.totalorder %s948_s17, %s1234_s8 }
 0x448   : > { %p950_p5 = pnand %p949_p4, %p1289_p11 }
 0x449   : > { %p955_p3 = por %p954_p1, %p953_p9 }
 0x44a   : > { %p951_p7 = pneg %p950_p5 }
 0x44b   : > { %p957_p12 = por %p956_p6, %p955_p3 }
 0x44d   : > { %p958_p13 = pnand %p957_p12, %p951_p7 }
 0x44f   : > { %961 = shalt.err (!%p958_p13)
}
 0x450   : > { %804 = dma.vmem_to_hbm [thread:$0]  (%p1289_p11), %s1236_s15, 256, %s1234_s8, %s636_s22  }
 0x451 PF: > { %s662_s12 = sand.u32 1, %s988_s18   ;;  %p1290_p8 = scmp.ne.s32.totalorder %s1287_s30, 0 }
 0x452   : > { %p1291_p10 = scmp.ge.s32.totalorder %s1000_s21, 2  ;;  %s663_s14 = scalar_lea.sflag [#allocation4], %s662_s12 }
 0x454   : > { %p811_p0 = pnand %p1291_p10, %p1290_p8 }
 0x456   : > { %983 = dma.done.wait (!%p811_p0), %s663_s14, 256  }
 0x457   : > { %985 = vsyncadd (!%p811_p0), %s663_s14, 4294967040  ;;  %p18_p2 = scmp.ge.s32.totalorder %s1063_s24, 4   ;;  %s1292_s18 = smov %s992_s19 }
 0x458   : > { %s1293_s19 = smov %s996_s20  ;;  %s1294_s20 = smov %s1075_s27 }
 0x459   : > { %s1295_s21 = smov %s1063_s24  ;;  %20 = sbr.rel (!%p18_p2) target bundleno = 5 (0x5), region = 85 }
 0x460   :  { %668 = vsyncpa [#allocation3], 1 }
 0x461   :  { %670 = vsyncpa [#allocation3 + $0x1], 1 }
 0x462   :  { %671 = vsyncpa [#allocation4], 1 }
 0x463   :  { %673 = vsyncpa [#allocation4 + $0x1], 1 }

</bundles_post_ra>
